<compile_context>
chip_gen: v5e
topology: v5e:2x2
jax: 0.10.0
libtpu: 0.0.40
codegen_flags: <defaults>
</compile_context>

<pallas_src>
import functools

import jax
import jax.numpy as jnp
from jax.experimental import pallas as pl
from jax.experimental.pallas import tpu as pltpu

_LANES = 128
_MAX_TILE_M = 512  # rows per grid step (256 KiB / f32 input buffer)


def _bce_partial_kernel(x_ref, t_ref, out_ref, *, total, tile_m):
    """Per-tile numerically-stable BCE-with-logits, reduced to an (8,128) partial."""
    i = pl.program_id(0)

    x = x_ref[...].astype(jnp.float32)   # (tile_m, 128)
    t = t_ref[...].astype(jnp.float32)

    # PyTorch's stable formulation: max(x,0) - x*t + log1p(exp(-|x|))
    per = jnp.maximum(x, 0.0) - x * t + jnp.log1p(jnp.exp(-jnp.abs(x)))

    # Mask padded elements (global flat index >= total contributes 0).
    row = jax.lax.broadcasted_iota(jnp.int32, (tile_m, _LANES), 0)
    lane = jax.lax.broadcasted_iota(jnp.int32, (tile_m, _LANES), 1)
    flat = (i * tile_m + row) * _LANES + lane
    per = jnp.where(flat < total, per, 0.0)

    # Reduce sublane-groups of 8 with VPU adds only (no cross-lane XLU reduce).
    partial = per.reshape(tile_m // 8, 8, _LANES).sum(axis=0)   # (8, 128)
    out_ref[0] = partial


def classification_loss(logits, targets, recursive_params=None):
    """Pallas equivalent of ClassificationLoss.forward.

    logits:  (batch, N) float (f32 or bf16)
    targets: (batch, N) float
    recursive_params: (N, hidden_dim) -- unused, kept for signature parity.
    Returns a scalar float32 loss (mean BCE-with-logits over all elements).
    """
    del recursive_params  # unused in the reference forward pass
    assert logits.shape == targets.shape

    total = int(logits.size)                       # true element count (static)
    rows = -(-total // _LANES)                     # lane-dense rows needed
    rows_min8 = ((rows + 7) // 8) * 8              # sublane-tile aligned
    tile_m = min(_MAX_TILE_M, rows_min8)           # rows per grid step (mult of 8)
    rows_padded = ((rows_min8 + tile_m - 1) // tile_m) * tile_m
    padded = rows_padded * _LANES
    num_tiles = rows_padded // tile_m

    # Lane-dense reshape in the wrapper (contiguous -> essentially free in XLA).
    x = jnp.ravel(logits)
    t = jnp.ravel(targets)
    if padded > total:
        x = jnp.pad(x, (0, padded - total))
        t = jnp.pad(t, (0, padded - total))
    x = x.reshape(rows_padded, _LANES)
    t = t.reshape(rows_padded, _LANES)

    kernel = functools.partial(_bce_partial_kernel, total=total, tile_m=tile_m)

    in_bytes = x.dtype.itemsize + t.dtype.itemsize
    partials = pl.pallas_call(
        kernel,
        out_shape=jax.ShapeDtypeStruct((num_tiles, 8, _LANES), jnp.float32),
        grid_spec=pl.GridSpec(
            grid=(num_tiles,),
            in_specs=[
                pl.BlockSpec((tile_m, _LANES), lambda i: (i, 0)),
                pl.BlockSpec((tile_m, _LANES), lambda i: (i, 0)),
            ],
            out_specs=pl.BlockSpec((1, 8, _LANES), lambda i: (i, 0, 0)),
        ),
        compiler_params=pltpu.CompilerParams(
            dimension_semantics=("parallel",),
        ),
        cost_estimate=pl.CostEstimate(
            flops=5 * padded,
            transcendentals=2 * padded,
            bytes_accessed=padded * in_bytes + num_tiles * 8 * _LANES * 4,
        ),
    )(x, t)

    # Final tiny reduction + mean in plain JAX (negligible cost).
    return jnp.sum(partials) / jnp.float32(total)


def _reference(logits, targets):
    x = logits.astype(jnp.float32)
    t = targets.astype(jnp.float32)
    return jnp.mean(jnp.maximum(x, 0.0) - x * t + jnp.log1p(jnp.exp(-jnp.abs(x))))


if __name__ == "__main__":
    key = jax.random.PRNGKey(0)
    k1, k2, k3, k4, k5 = jax.random.split(key, 5)

    # Shapes implied by the module: logits/targets (batch, N), params (N, hidden).
    batch, n_labels, hidden = 2, 8, 32
    logits = jax.random.normal(k1, (batch, n_labels), dtype=jnp.float32)
    targets = (jax.random.uniform(k2, (batch, n_labels)) > 0.5).astype(jnp.float32)
    recursive_params = jax.random.normal(k3, (n_labels, hidden), dtype=jnp.float32)

    loss = classification_loss(logits, targets, recursive_params)
    jax.block_until_ready(loss)
    ref = _reference(logits, targets)
    assert jnp.allclose(loss, ref, atol=1e-6, rtol=1e-5), (loss, ref)

    # Second check exercising multiple grid tiles + padding mask.
    logits2 = jax.random.normal(k4, (600, 128), dtype=jnp.float32)
    targets2 = (jax.random.uniform(k5, (600, 128)) > 0.5).astype(jnp.float32)
    loss2 = classification_loss(logits2, targets2)
    jax.block_until_ready(loss2)
    ref2 = _reference(logits2, targets2)
    assert jnp.allclose(loss2, ref2, atol=1e-6, rtol=1e-5), (loss2, ref2)

    print("KERNEL_OK")
</pallas_src>

<mosaic_0001>
module attributes {stable_mosaic.version = 11 : i64} {
  func.func @_bce_partial_kernel(%arg0: i32, %arg1: memref<8x128xf32, #tpu.memory_space<vmem>>, %arg2: memref<8x128xf32, #tpu.memory_space<vmem>>, %arg3: memref<1x8x128xf32, #tpu.memory_space<vmem>>) attributes {dimension_semantics = [#tpu.dimension_semantics<parallel>], iteration_bounds = array<i64: 1>, scalar_prefetch = 0 : i64, scratch_operands = 0 : i64, tpu.core_type = #tpu.core_type<tc>, window_params = [{transform_indices = @transform_0, window_bounds = array<i64: 8, 128>}, {transform_indices = @transform_1, window_bounds = array<i64: 8, 128>}, {transform_indices = @transform_2, window_bounds = array<i64: 1, 8, 128>}]} {
    %c0 = arith.constant 0 : index
    %c0_0 = arith.constant 0 : index
    %0 = vector.load %arg1[%c0, %c0_0] : memref<8x128xf32, #tpu.memory_space<vmem>>, vector<8x128xf32>
    %c0_1 = arith.constant 0 : index
    %c0_2 = arith.constant 0 : index
    %1 = vector.load %arg2[%c0_1, %c0_2] : memref<8x128xf32, #tpu.memory_space<vmem>>, vector<8x128xf32>
    %cst = arith.constant 0.000000e+00 : f32
    %2 = vector.broadcast %cst : f32 to vector<8x128xf32>
    %3 = arith.maximumf %0, %2 : vector<8x128xf32>
    %4 = arith.mulf %0, %1 : vector<8x128xf32>
    %5 = arith.subf %3, %4 : vector<8x128xf32>
    %6 = math.absf %0 : vector<8x128xf32>
    %cst_3 = arith.constant 0.000000e+00 : f32
    %7 = vector.broadcast %cst_3 : f32 to vector<8x128xf32>
    %8 = arith.subf %7, %6 : vector<8x128xf32>
    %9 = math.exp %8 : vector<8x128xf32>
    %10 = math.log1p %9 : vector<8x128xf32>
    %11 = arith.addf %5, %10 : vector<8x128xf32>
    %12 = tpu.iota {dimensions = array<i32: 0>} : vector<8x128xi32>
    %13 = tpu.iota {dimensions = array<i32: 1>} : vector<8x128xi32>
    %c8_i32 = arith.constant 8 : i32
    %14 = arith.muli %arg0, %c8_i32 : i32
    %15 = vector.broadcast %14 : i32 to vector<8x128xi32>
    %16 = arith.addi %15, %12 : vector<8x128xi32>
    %c128_i32 = arith.constant 128 : i32
    %17 = vector.broadcast %c128_i32 : i32 to vector<8x128xi32>
    %18 = arith.muli %16, %17 : vector<8x128xi32>
    %19 = arith.addi %18, %13 : vector<8x128xi32>
    %c16_i32 = arith.constant 16 : i32
    %20 = vector.broadcast %c16_i32 : i32 to vector<8x128xi32>
    %21 = arith.cmpi slt, %19, %20 : vector<8x128xi32>
    %cst_4 = arith.constant 0.000000e+00 : f32
    %22 = vector.broadcast %cst_4 : f32 to vector<8x128xf32>
    %23 = arith.select %21, %11, %22 : vector<8x128xi1>, vector<8x128xf32>
    %24 = vector.shape_cast %23 : vector<8x128xf32> to vector<1x8x128xf32>
    %cst_5 = arith.constant dense<0.000000e+00> : vector<8x128xf32>
    %25 = vector.multi_reduction <add>, %24, %cst_5 [0] : vector<1x8x128xf32> to vector<8x128xf32>
    %c0_6 = arith.constant 0 : index
    %c0_7 = arith.constant 0 : index
    %c0_8 = arith.constant 0 : index
    %26 = vector.load %arg3[%c0_6, %c0_7, %c0_8] : memref<1x8x128xf32, #tpu.memory_space<vmem>>, vector<1x8x128xf32>
    %27 = vector.shape_cast %26 : vector<1x8x128xf32> to vector<8x128xf32>
    %28 = vector.shape_cast %25 : vector<8x128xf32> to vector<1x8x128xf32>
    tpu.vector_store %arg3[%c0_6, %c0_7, %c0_8], %28 {strides = array<i32>} : memref<1x8x128xf32, #tpu.memory_space<vmem>>, vector<1x8x128xf32>,
    return
  }
  func.func @transform_0(%arg0: i32) -> (i32, i32) {
    %c0_i32 = arith.constant 0 : i32
    %c0_i32_0 = arith.constant 0 : i32
    return %arg0, %c0_i32 : i32, i32
  }
  func.func @transform_1(%arg0: i32) -> (i32, i32) {
    %c0_i32 = arith.constant 0 : i32
    %c0_i32_0 = arith.constant 0 : i32
    return %arg0, %c0_i32 : i32, i32
  }
  func.func @transform_2(%arg0: i32) -> (i32, i32, i32) {
    %c0_i32 = arith.constant 0 : i32
    %c0_i32_0 = arith.constant 0 : i32
    %c0_i32_1 = arith.constant 0 : i32
    return %arg0, %c0_i32, %c0_i32_0 : i32, i32, i32
  }
}

</mosaic_0001>

<bundles_post_ra>
// kernel: tpu_custom_call.1
= control target key start
LH: loop header
LB: loop body
LE: loop exit
PB: predicated region body
PF: predicated region fallthrough
CT: control target
= control target key end

     0   :  { %7 = vsyncpa [#allocation3], 0  ;;  %s202_s0 = inlined_call_operand.hbm [shape: f32[8,128], index: 0, kind: input, shape index: {}]   ;;  %s203_s1 = inlined_call_operand.hbm [shape: f32[8,128], index: 1, kind: input, shape index: {}]   ;;  %s204_s2 = inlined_call_operand.hbm [shape: f32[1,8,128], index: 2, kind: output, shape index: {}]  }
   0x1   :  { %8 = vsyncpa [#allocation6], 0 }
   0x2   :  { %9 = vsyncpa [#allocation4], 0  ;;  %s15_s11 = sshll.u32 %s202_s0, 4  ;;  %s175_s12 = smov [#allocation2]   ;;  %s16_s11 = int_to_ptr.hbm [resolvable:$true] %s15_s11 }
   0x3   :  { %s17_s13 = sshll.u32 %s175_s12, 4  ;;  %s26_s16 = sshll.u32 %s203_s1, 4  ;;  %s18_s13 = int_to_ptr.vmem [resolvable:$true] %s17_s13  ;;  %s27_s16 = int_to_ptr.hbm [resolvable:$true] %s26_s16 }
   0x4   :  { %20 = dma.hbm_to_vmem [thread:$0]  %s16_s11, 128, %s18_s13, [#allocation3]  }
   0x5   :  { %s176_s17 = smov [#allocation5]  }
   0x6   :  { %s28_s18 = sshll.u32 %s176_s17, 4  ;;  %s29_s18 = int_to_ptr.vmem [resolvable:$true] %s28_s18 }
   0x7   :  { %31 = dma.hbm_to_vmem [thread:$0]  %s27_s16, 128, %s29_s18, [#allocation6]  }
   0x8   :  { %169 = dma.done.wait [#allocation3], 128  }
   0x9   :  { %170 = vsyncadd [#allocation3], 4294967168 }
   0xa   :  { %171 = dma.done.wait [#allocation6], 128  }
   0xb   :  { %172 = vsyncadd [#allocation6], 4294967168  ;;  %v40_v0 = vld [vmem:[#allocation2] sm:$0xff]  ;;  %v59_v4 = vlaneseq  ;;  %v41_v9 = vld [vmem:[#allocation5] sm:$0xff]  ;;  %s177_s0 = smov [#allocation7]   ;;  %s79_s21 = sshll.u32 %s204_s2, 4  ;;  %s80_s21 = int_to_ptr.hbm [resolvable:$true] %s79_s21 }
   0xc   :  { %v45_v1 = vand.u32 2147483647, %v40_v0  ;;  %v42_v13 = vmax.f32 %v40_v0, 0.0  ;;  %v43_v14 = vmul.f32 %v41_v9, %v40_v0  ;;  %s77_s1 = sshll.u32 %s177_s0, 4  ;;  %s78_s1 = int_to_ptr.vmem [resolvable:$true] %s77_s1 }
   0xd   :  { %v60_v6 = vshrl.u32 %v59_v4, 7  ;;  %v62_v11 = vand.u32 127, %v59_v4 }
   0xe   :  { %v46_v2 = vsub.f32 0.0, %v45_v1  ;;  %v44_v19 = vsub.f32 %v42_v13, %v43_v14 }
   0xf   :  { %v66_v12 = vmul.u32 128, %v60_v6 }
  0x10   :  { %v47_v3 = vmul.f32 1.442695, %v46_v2 }
  0x11   :  { %v67_v17 = vadd.s32 %v66_v12, %v62_v11 }
  0x12   :  { %93 = vpow2.f32 %v47_v3 }
  0x13   :  { %vm68_vm1 = vcmp.lt.s32.totalorder %v67_v17, 16 }
  0x18   :  { %v94_v5 = vpop.eup %93 }
  0x19   :  { %v49_v7 = vadd.f32 1.0, %v94_v5  ;;  %v52_v8 = vmul.f32 -0.5, %v94_v5  ;;  %v55_v15 = vand.u32 2147483647, %v94_v5 }
  0x1b   :  { %95 = vlog2.f32 %v49_v7  ;;  %v53_v10 = vadd.f32 1.0, %v52_v8  ;;  %vm56_vm0 = vcmp.lt.f32.partialorder %v55_v15, 0.0004427343 }
  0x1d   :  { %v54_v16 = vmul.f32 %v94_v5, %v53_v10 }
  0x21   :  { %v96_v18 = vpop.eup %95 }
  0x22   :  { %v51_v20 = vmul.f32 0.6931472, %v96_v18 }
  0x24   :  { %v57_v21 = vsel %vm56_vm0, %v54_v16, %v51_v20 }
  0x25   :  { %v58_v22 = vadd.f32 %v57_v21, %v44_v19 }
  0x27   :  { %v69_v23 = vsel %vm68_vm1, %v58_v22, 0.0 }
  0x28   :  { %71 = vst [vmem:[#allocation7] sm:$0xff] %v69_v23 }
  0x29   :  { %82 = dma.vmem_to_hbm [thread:$0]  %s78_s1, 128, %s80_s21, [#allocation4]  }
  0x2a   :  { %173 = dma.done.wait [#allocation4], 128  }
  0x2b   :  { %174 = vsyncadd [#allocation4], 4294967168 }
  0x2c   :  { %87 = vsyncpa [#allocation3], 1 }
  0x2d   :  { %88 = vsyncpa [#allocation6], 1 }
  0x2e   :  { %89 = vsyncpa [#allocation4], 1 }

</bundles_post_ra>
